<compile_context>
chip_gen: v6e
topology: v6e:2x2x1
jax: 0.10.0
libtpu: 0.0.40
codegen_flags: <defaults>
</compile_context>

<pallas_src>
import jax
import jax.numpy as jnp
from jax.experimental import pallas as pl
from jax.experimental.pallas import tpu as pltpu


# ---------------------------------------------------------------------------
# Kernels
# ---------------------------------------------------------------------------

def _chord_fused_kernel(x_ref, e_ref, invx_ref, inve_ref, d_ref):
    """One (TN, TM) output tile, full K in a single MXU pass.

    d[n, m] = || x[n]/||x[n]|| - e[m]/||e[m]|| ||_2
            = sqrt(max(2 - 2 * (x[n] . e[m]) * inv_x[n] * inv_e[m], 0))
    """
    g = jax.lax.dot_general(
        x_ref[...], e_ref[...],
        dimension_numbers=(((1,), (1,)), ((), ())),
        preferred_element_type=jnp.float32,
    )
    scale = invx_ref[...] * inve_ref[...]            # (tn,1)*(1,tm) -> (tn,tm), VPU
    d_sq = jnp.maximum(2.0 - 2.0 * g * scale, 0.0)   # clamp fp overshoot before sqrt
    d_ref[...] = jnp.sqrt(d_sq)


def _chord_ksplit_kernel(x_ref, e_ref, invx_ref, inve_ref, d_ref):
    """K-split fallback: accumulate the raw Gram tile directly into d_ref (its block
    index is k-invariant so it stays resident in VMEM), finalize at the last k step."""
    k = pl.program_id(2)

    @pl.when(k == 0)
    def _():
        d_ref[...] = jnp.zeros_like(d_ref)

    d_ref[...] += jax.lax.dot_general(
        x_ref[...], e_ref[...],
        dimension_numbers=(((1,), (1,)), ((), ())),
        preferred_element_type=jnp.float32,
    )

    @pl.when(k == pl.num_programs(2) - 1)
    def _():
        scale = invx_ref[...] * inve_ref[...]
        d_sq = jnp.maximum(2.0 - 2.0 * d_ref[...] * scale, 0.0)
        d_ref[...] = jnp.sqrt(d_sq)


# ---------------------------------------------------------------------------
# Wrapper
# ---------------------------------------------------------------------------

def _round_up(a, b):
    return -(-a // b) * b


def _row_inv_norms(a):
    """1 / max(||row||_2, 1e-12)  (torch F.normalize semantics), in f32."""
    a32 = a.astype(jnp.float32)
    sq = jnp.sum(a32 * a32, axis=-1, keepdims=True)
    eps = jnp.float32(1e-12)
    return jax.lax.rsqrt(jnp.maximum(sq, eps * eps))


def _vmem_limit_bytes():
    """~75% of physical per-core VMEM, capped at 96 MiB (v7x-safe ~48 MiB)."""
    cap = 64 * 1024 * 1024
    try:
        cap = int(pltpu.get_tpu_info().vmem_capacity_bytes)
    except Exception:
        pass
    return min(int(cap * 0.75), 96 * 1024 * 1024)


def pairwise_chord_distance(x, embed, *, tn=None, tm=None, tk=512,
                            compute_dtype=jnp.bfloat16, force_k_split=False):
    """(N, M) matrix of || normalize(x[n]) - normalize(embed[m]) ||_2 via Pallas."""
    N, D = x.shape
    M, D2 = embed.shape
    assert D == D2, (D, D2)

    # Per-row inverse norms (f32): normalization is folded into the kernel finalize,
    # so x / embed never get re-written through HBM as normalized copies.
    inv_x = _row_inv_norms(x)                      # (N, 1) f32
    inv_e = _row_inv_norms(embed).reshape(1, M)    # (1, M) f32

    xc = x.astype(compute_dtype)
    ec = embed.astype(compute_dtype)
    cbytes = jnp.dtype(compute_dtype).itemsize

    # MXU-256-aligned output tiles; bump to 512 only when the axis still yields >= 2
    # parallel blocks (keeps both v7x TensorCores busy).  Dims smaller than a tile use
    # a single full-extent block (always a legal block shape).
    if tn is None:
        tn = N if N < 256 else (512 if N >= 1024 else 256)
    if tm is None:
        tm = M if M < 256 else (512 if M >= 1024 else 256)

    gi, gj = pl.cdiv(N, tn), pl.cdiv(M, tm)
    vmem_limit = _vmem_limit_bytes()
    # Double-buffered inputs + output blocks + inv-norm blocks for the fused path.
    fused_vmem = 2 * (tn + tm) * D * cbytes + 2 * tn * tm * 4 + 2 * (tn + tm) * 4

    if not force_k_split and fused_vmem <= vmem_limit // 2:
        # ---- fused full-K path: 2-D grid, no padding at all ----
        return pl.pallas_call(
            _chord_fused_kernel,
            out_shape=jax.ShapeDtypeStruct((N, M), jnp.float32),
            grid=(gi, gj),
            in_specs=[
                pl.BlockSpec((tn, D), lambda i, j: (i, 0)),   # x block reused across j
                pl.BlockSpec((tm, D), lambda i, j: (j, 0)),
                pl.BlockSpec((tn, 1), lambda i, j: (i, 0)),
                pl.BlockSpec((1, tm), lambda i, j: (0, j)),
            ],
            out_specs=pl.BlockSpec((tn, tm), lambda i, j: (i, j)),
            compiler_params=pltpu.CompilerParams(
                dimension_semantics=("parallel", "parallel"),
                vmem_limit_bytes=vmem_limit,
            ),
            cost_estimate=pl.CostEstimate(
                flops=2 * N * M * D,
                transcendentals=0,
                bytes_accessed=(N + M) * D * cbytes + N * M * 4 + (N + M) * 4,
            ),
        )(xc, ec, inv_x, inv_e)

    # ---- K-split fallback (huge D): 3-D grid, zero-pad only along K ----
    tk = min(tk, _round_up(D, 128))
    kpad = _round_up(D, tk)
    xc = jnp.pad(xc, ((0, 0), (0, kpad - D)))
    ec = jnp.pad(ec, ((0, 0), (0, kpad - D)))
    return pl.pallas_call(
        _chord_ksplit_kernel,
        out_shape=jax.ShapeDtypeStruct((N, M), jnp.float32),
        grid=(gi, gj, kpad // tk),
        in_specs=[
            pl.BlockSpec((tn, tk), lambda i, j, k: (i, k)),
            pl.BlockSpec((tm, tk), lambda i, j, k: (j, k)),
            pl.BlockSpec((tn, 1), lambda i, j, k: (i, 0)),
            pl.BlockSpec((1, tm), lambda i, j, k: (0, j)),
        ],
        out_specs=pl.BlockSpec((tn, tm), lambda i, j, k: (i, j)),
        compiler_params=pltpu.CompilerParams(
            dimension_semantics=("parallel", "parallel", "arbitrary"),
            vmem_limit_bytes=vmem_limit,
        ),
        cost_estimate=pl.CostEstimate(
            flops=2 * N * M * kpad,
            transcendentals=0,
            bytes_accessed=(N * gj + M * gi) * kpad * cbytes + N * M * 4 + (N + M) * 4,
        ),
    )(xc, ec, inv_x, inv_e)


# ---------------------------------------------------------------------------
# Prompt forward + reference
# ---------------------------------------------------------------------------

def prompt_forward(x, embed, weight, stop=float("-inf"), **dist_kwargs):
    """Forward pass of `Prompt`: abs(weight) * mean(2 * arcsin(d/2)^2 * sign(weight))."""
    d = pairwise_chord_distance(x, embed, **dist_kwargs)
    w = jnp.asarray(weight, jnp.float32)
    half = jnp.clip(d * 0.5, 0.0, 1.0)            # guard arcsin domain against fp overshoot
    dists = 2.0 * jnp.square(jnp.arcsin(half))
    dists = dists * jnp.sign(w)
    # TODO(synk): replace_grad(dists, maximum(dists, stop)) only shapes the backward
    # pass; the forward value is just `dists`, so `stop` is unused here.
    return jnp.abs(w) * jnp.mean(dists)


def prompt_reference(x, embed, weight):
    """Pure-JAX transliteration of the PyTorch forward, for verification."""
    eps = 1e-12
    xn = x / jnp.maximum(jnp.linalg.norm(x, axis=1, keepdims=True), eps)
    en = embed / jnp.maximum(jnp.linalg.norm(embed, axis=1, keepdims=True), eps)
    d = jnp.linalg.norm(xn[:, None, :] - en[None, :, :], axis=2)
    dists = 2.0 * jnp.arcsin(d / 2.0) ** 2
    w = jnp.asarray(weight, jnp.float32)
    dists = dists * jnp.sign(w)
    return jnp.abs(w) * jnp.mean(dists)


if __name__ == "__main__":
    key = jax.random.PRNGKey(0)
    kx, ke = jax.random.split(key)

    # Non-tile-aligned small shapes: exercise full-extent N/M blocks (no padding),
    # a non-multiple-of-128 full-K lane dim (D=320), and the K-split fallback below.
    N, M, D = 192, 80, 320
    x = jax.random.normal(kx, (N, D), dtype=jnp.float32)
    embed = jax.random.normal(ke, (M, D), dtype=jnp.float32)   # buffer `embed`
    weight = 0.75                                              # buffer `weight`
    stop = float("-inf")                                       # buffer `stop` (backward-only)

    ref = jax.block_until_ready(prompt_reference(x, embed, weight))

    # Default path: bf16 operands, fused full-K 2-D grid.
    out = jax.block_until_ready(prompt_forward(x, embed, weight, stop))
    assert out.shape == () and out.dtype == jnp.float32
    assert jnp.allclose(out, ref, atol=1e-3, rtol=1e-3), (out, ref)

    # K-split fallback path (used when a (tile, D) block would not fit VMEM).
    out_split = jax.block_until_ready(
        prompt_forward(x, embed, weight, stop, force_k_split=True, tk=128))
    assert jnp.allclose(out_split, ref, atol=1e-3, rtol=1e-3), (out_split, ref)

    print("KERNEL_OK")
</pallas_src>

<mosaic_0001>
module attributes {stable_mosaic.version = 11 : i64} {
  func.func @_chord_fused_kernel(%arg0: i32, %arg1: i32, %arg2: memref<192x320xbf16, #tpu.memory_space<vmem>>, %arg3: memref<80x320xbf16, #tpu.memory_space<vmem>>, %arg4: memref<192x1xf32, #tpu.memory_space<vmem>>, %arg5: memref<1x80xf32, #tpu.memory_space<vmem>>, %arg6: memref<192x80xf32, #tpu.memory_space<vmem>>) attributes {dimension_semantics = [#tpu.dimension_semantics<parallel>, #tpu.dimension_semantics<parallel>], iteration_bounds = array<i64: 1, 1>, scalar_prefetch = 0 : i64, scratch_operands = 0 : i64, tpu.core_type = #tpu.core_type<tc>, window_params = [{transform_indices = @transform_0, window_bounds = array<i64: 192, 320>}, {transform_indices = @transform_1, window_bounds = array<i64: 80, 320>}, {transform_indices = @transform_2, window_bounds = array<i64: 192, 1>}, {transform_indices = @transform_3, window_bounds = array<i64: 1, 80>}, {transform_indices = @transform_4, window_bounds = array<i64: 192, 80>}]} {
    %c0 = arith.constant 0 : index
    %c0_0 = arith.constant 0 : index
    %0 = vector.load %arg2[%c0, %c0_0] : memref<192x320xbf16, #tpu.memory_space<vmem>>, vector<192x320xbf16>
    %c0_1 = arith.constant 0 : index
    %c0_2 = arith.constant 0 : index
    %1 = vector.load %arg3[%c0_1, %c0_2] : memref<80x320xbf16, #tpu.memory_space<vmem>>, vector<80x320xbf16>
    %cst = arith.constant dense<0.000000e+00> : vector<192x80xf32>
    %2 = tpu.matmul %0, %1, %cst {dimension_numbers = #tpu.dot_dimension_numbers<[1], [1], [0], [0], [0, 0, 1, 0], [], []>} : vector<192x320xbf16>, vector<80x320xbf16>, vector<192x80xf32> -> vector<192x80xf32>
    %c0_3 = arith.constant 0 : index
    %c0_4 = arith.constant 0 : index
    %3 = vector.load %arg4[%c0_3, %c0_4] : memref<192x1xf32, #tpu.memory_space<vmem>>, vector<192x1xf32>
    %c0_5 = arith.constant 0 : index
    %c0_6 = arith.constant 0 : index
    %4 = vector.load %arg5[%c0_5, %c0_6] : memref<1x80xf32, #tpu.memory_space<vmem>>, vector<1x80xf32>
    %5 = vector.broadcast %3 : vector<192x1xf32> to vector<192x80xf32>
    %6 = vector.broadcast %4 : vector<1x80xf32> to vector<192x80xf32>
    %7 = arith.mulf %5, %6 : vector<192x80xf32>
    %cst_7 = arith.constant 2.000000e+00 : f32
    %8 = vector.broadcast %cst_7 : f32 to vector<192x80xf32>
    %9 = arith.mulf %8, %2 : vector<192x80xf32>
    %10 = arith.mulf %9, %7 : vector<192x80xf32>
    %cst_8 = arith.constant 2.000000e+00 : f32
    %11 = vector.broadcast %cst_8 : f32 to vector<192x80xf32>
    %12 = arith.subf %11, %10 : vector<192x80xf32>
    %cst_9 = arith.constant 0.000000e+00 : f32
    %13 = vector.broadcast %cst_9 : f32 to vector<192x80xf32>
    %14 = arith.maximumf %12, %13 : vector<192x80xf32>
    %15 = math.sqrt %14 : vector<192x80xf32>
    %c0_10 = arith.constant 0 : index
    %c0_11 = arith.constant 0 : index
    %16 = vector.load %arg6[%c0_10, %c0_11] : memref<192x80xf32, #tpu.memory_space<vmem>>, vector<192x80xf32>
    tpu.vector_store %arg6[%c0_10, %c0_11], %15 {strides = array<i32>} : memref<192x80xf32, #tpu.memory_space<vmem>>, vector<192x80xf32>,
    return
  }
  func.func @transform_0(%arg0: i32, %arg1: i32) -> (i32, i32) {
    %c0_i32 = arith.constant 0 : i32
    %c0_i32_0 = arith.constant 0 : i32
    return %arg0, %c0_i32 : i32, i32
  }
  func.func @transform_1(%arg0: i32, %arg1: i32) -> (i32, i32) {
    %c0_i32 = arith.constant 0 : i32
    %c0_i32_0 = arith.constant 0 : i32
    return %arg1, %c0_i32 : i32, i32
  }
  func.func @transform_2(%arg0: i32, %arg1: i32) -> (i32, i32) {
    %c0_i32 = arith.constant 0 : i32
    %c0_i32_0 = arith.constant 0 : i32
    return %arg0, %c0_i32 : i32, i32
  }
  func.func @transform_3(%arg0: i32, %arg1: i32) -> (i32, i32) {
    %c0_i32 = arith.constant 0 : i32
    %c0_i32_0 = arith.constant 0 : i32
    return %c0_i32, %arg1 : i32, i32
  }
  func.func @transform_4(%arg0: i32, %arg1: i32) -> (i32, i32) {
    %c0_i32 = arith.constant 0 : i32
    return %arg0, %arg1 : i32, i32
  }
}

</mosaic_0001>

<bundles_post_ra>
// kernel: tpu_custom_call.1
= control target key start
LH: loop header
LB: loop body
LE: loop exit
PB: predicated region body
PF: predicated region fallthrough
CT: control target
= control target key end

     0   :  { %9 = vsyncpa [#allocation3], 0  ;;  %s1398_s15 = smov [#allocation2]   ;;  %s1870_s0 = inlined_call_operand.hbm [shape: bf16[192,320], index: 0, kind: input, shape index: {}]   ;;  %s1871_s1 = inlined_call_operand.vmem [shape: bf16[80,320], index: 1, kind: input, shape index: {}]   ;;  %s1872_s2 = inlined_call_operand.vmem [shape: f32[192,1], index: 2, kind: input, shape index: {}]   ;;  %s1873_s3 = inlined_call_operand.vmem [shape: f32[1,80], index: 3, kind: input, shape index: {}]   ;;  %s1874_s4 = inlined_call_operand.vmem [shape: f32[192,80], index: 4, kind: output, shape index: {}]  }
   0x1   :  { %s15_s16 = sshll.u32 %s1398_s15, 4  ;;  %s16_s16 = int_to_ptr.vmem [resolvable:$true] %s15_s16 }
   0x2   :  { %s1384_s17 = scalar_lea.vmem %s16_s16, 4608  ;;  %p1389_p1 = scmp.lt.s32.totalorder %s16_s16, %s16_s16 }
   0x3   :  { %p1385_p0 = scmp.ne.s32.totalorder %s16_s16, %s1384_s17  ;;  %p1390_p2 = scmp.lt.s32.totalorder %s1384_s17, %s1384_s17 }
   0x5   :  { %p1391_p3 = por %p1390_p2, %p1389_p1 }
   0x7   :  { %p1392_p4 = pnand %p1391_p3, %p1385_p0 }
   0x9   :  { %1395 = shalt.err (!%p1392_p4)
}
   0xa   :  { %s1399_s18 = smov 192   ;;  %s1400_s19 = smov 12  }
   0xb   :  { %21 = dma.hbm_to_vmem [thread:$0]  %s1870_s0, 4608, %s16_s16, [#allocation3], %s1399_s18, %s1399_s18, %s1400_s19  }
   0xc   :  { %1396 = dma.done.wait [#allocation3], 4608  }
   0xd   :  { %1397 = vsyncadd [#allocation3], 4294962688  ;;  %v1401_v0 = vmov 0   ;;  %v1260_v1 = vld [vmem:[%s1871_s1 + $0x64] ss:$12 sps:$4 sm:$0xff]   ;;  %vm355_vm0 = vcmask 523264  }
   0xe   :  { %1258 = vset.pattern.permute.xlu0 %v1401_v0  ;;  %1259 = vset.pattern.permute.xlu1 %v1401_v0  ;;  %v1262_v2 = vld [vmem:[%s1871_s1 + $0x68] ss:$12 sps:$4 sm:$0xff]   ;;  %v1263_v3 = vld [vmem:[%s1871_s1 + $0x60] ss:$12 sps:$4 sm:$0xff]   ;;  %v1266_v6 = vld [vmem:[%s1871_s1 + $0x50] ss:$12 sps:$4 sm:$0xff]  }
   0xf   :  { %413 = vmatprep.subr.bf16.mxu0 %v1260_v1  ;;  %1249 = vmatprep.subr.msk.bf16.mxu1 %vm355_vm0, %v1262_v2  ;;  %v405_v4 = vsel %vm355_vm0, %v1262_v2, 0  ;;  %v1264_v5 = vld [vmem:[%s1871_s1 + $0x4c] ss:$12 sps:$4 sm:$0xff]   ;;  %v1267_v7 = vld [vmem:[%s1871_s1 + $0x48] ss:$12 sps:$4 sm:$0xff]   ;;  %v402_v8 = vsel %vm355_vm0, %v1266_v6, 0 }
  0x10   :  { %414 = vmatpush1.bf16.xpose.msra.mxu0 %v1263_v3  ;;  %1216 = vmatpush3.bf16.xpose.msra.mxu1 %v405_v4  ;;  %v1268_v9 = vld [vmem:[%s1871_s1 + $0x34] ss:$12 sps:$4 sm:$0xff]   ;;  %v1270_v10 = vld [vmem:[%s1871_s1 + $0x38] ss:$12 sps:$4 sm:$0xff]   ;;  %v1271_v13 = vld [vmem:[%s1871_s1 + $0x30] ss:$12 sps:$4 sm:$0xff]  }
  0x11   :  { %415 = vmatprep.subr.bf16.mxu0 %v1264_v5  ;;  %1250 = vmatprep.subr.msk.bf16.mxu1 %vm355_vm0, %v1266_v6  ;;  %v1282_v11 = vld [vmem:[#allocation2 + $0x4] ss:$12 sps:$4 sm:$0xff]   ;;  %v1283_v12 = vld [vmem:[#allocation2 + $0x8] ss:$12 sps:$4 sm:$0xff]   ;;  %v399_v15 = vsel %vm355_vm0, %v1270_v10, 0  ;;  %v668_v26 = vld [vmem:[%s1872_s2 + $0x18] sm:$0xff] }
  0x12   :  { %439 = vmatprep.mubr.bf16.mxu0 %v1282_v11  ;;  %v1272_v14 = vld [vmem:[%s1871_s1 + $0x1c] ss:$12 sps:$4 sm:$0xff]   ;;  %1225 = vmatprep.mubr.msk.bf16.mxu1 %vm355_vm0, %v1283_v12  ;;  %v1274_v16 = vld [vmem:[%s1871_s1 + $0x20] ss:$12 sps:$4 sm:$0xff]   ;;  %v1275_v17 = vld [vmem:[%s1871_s1 + $0x18] ss:$12 sps:$4 sm:$0xff]  }
  0x13   :  { %v1276_v18 = vld [vmem:[%s1871_s1 + $0x4] ss:$12 sps:$4 sm:$0xff]   ;;  %v396_v19 = vsel %vm355_vm0, %v1274_v16, 0  ;;  %v1278_v20 = vld [vmem:[%s1871_s1 + $0x8] ss:$12 sps:$4 sm:$0xff]   ;;  %v672_v33 = vld [vmem:[%s1872_s2 + $0x38] sm:$0xff] }
  0x14   :  { %v1279_v21 = vld [vmem:[%s1871_s1] ss:$12 sps:$4 sm:$0xff]   ;;  %v393_v22 = vsel %vm355_vm0, %v1278_v20, 0  ;;  %v667_v24 = vld [vmem:[%s1872_s2 + $0x10] sm:$0xff]  ;;  %v1285_v29 = vld [vmem:[#allocation2 + $0x1c] ss:$12 sps:$4 sm:$0xff]  }
  0x15   :  { %v665_v23 = vld [vmem:[%s1872_s2] sm:$0xff]  ;;  %702 = vperm.xlu1 %1259, %v667_v24   ;;  %v666_v25 = vld [vmem:[%s1872_s2 + $0x8] sm:$0xff]  ;;  %v671_v34 = vld [vmem:[%s1872_s2 + $0x30] sm:$0xff]  ;;  %vm1104_vm1 = vcmask 654336  }
  0x16   :  { %692 = vperm.xlu0 %1258, %v665_v23   ;;  %v1280_v27 = vld [vmem:[#allocation2] ss:$12 sps:$4 sm:$0xff]   ;;  %v1288_v30 = vld [vmem:[#allocation2 + $0x38] ss:$12 sps:$4 sm:$0xff]   ;;  %v1289_v36 = vld [vmem:[#allocation2 + $0x50] ss:$12 sps:$4 sm:$0xff]  }
  0x17   :  { %v1284_v28 = vld [vmem:[#allocation2 + $0x20] ss:$12 sps:$4 sm:$0xff]   ;;  %v1287_v35 = vld [vmem:[#allocation2 + $0x18] ss:$12 sps:$4 sm:$0xff]   ;;  %v1296_v38 = vld [vmem:[#allocation2 + $0x68] ss:$12 sps:$4 sm:$0xff]  }
  0x18   :  { %416 = vmatpush1.bf16.xpose.msra.mxu0 %v1267_v7  ;;  %1218 = vmatpush3.bf16.xpose.msra.mxu1 %v402_v8  ;;  %v670_v31 = vld [vmem:[%s1872_s2 + $0x28] sm:$0xff]  ;;  %v669_v32 = vld [vmem:[%s1872_s2 + $0x20] sm:$0xff]  ;;  %v676_v41 = vld [vmem:[%s1872_s2 + $0x58] sm:$0xff] }
  0x19   :  { %417 = vmatprep.subr.bf16.mxu0 %v1268_v9  ;;  %1251 = vmatprep.subr.msk.bf16.mxu1 %vm355_vm0, %v1270_v10  ;;  %v1290_v37 = vld [vmem:[#allocation2 + $0x34] ss:$12 sps:$4 sm:$0xff]   ;;  %v674_v39 = vld [vmem:[%s1872_s2 + $0x48] sm:$0xff]  ;;  %v1292_v43 = vld [vmem:[#allocation2 + $0x30] ss:$12 sps:$4 sm:$0xff]  }
  0x1a   :  { %697 = vperm.xlu0 %1258, %v666_v25   ;;  %707 = vperm.xlu1 %1259, %v668_v26   ;;  %v673_v40 = vld [vmem:[%s1872_s2 + $0x40] sm:$0xff]  ;;  %v675_v42 = vld [vmem:[%s1872_s2 + $0x50] sm:$0xff]  ;;  %v1293_v45 = vld [vmem:[#allocation2 + $0x4c] ss:$12 sps:$4 sm:$0xff]  }
  0x1b   :  { %v1297_v44 = vld [vmem:[#allocation2 + $0x80] ss:$12 sps:$4 sm:$0xff]   ;;  %v1304_v46 = vld [vmem:[#allocation2 + $0x98] ss:$12 sps:$4 sm:$0xff]   ;;  %v679_v50 = vld [vmem:[%s1872_s2 + $0x70] sm:$0xff] }
  0x1c   :  { %v678_v47 = vld [vmem:[%s1872_s2 + $0x68] sm:$0xff]  ;;  %v677_v48 = vld [vmem:[%s1872_s2 + $0x60] sm:$0xff]  ;;  %v680_v49 = vld [vmem:[%s1872_s2 + $0x78] sm:$0xff] }
  0x1d   :  { %v1295_v51 = vld [vmem:[#allocation2 + $0x48] ss:$12 sps:$4 sm:$0xff]   ;;  %v1305_v52 = vld [vmem:[#allocation2 + $0xb0] ss:$12 sps:$4 sm:$0xff]   ;;  %v681_v56 = vld [vmem:[%s1872_s2 + $0x80] sm:$0xff] }
  0x1e   :  { %717 = vperm.xlu1 %1259, %v670_v31   ;;  %712 = vperm.xlu0 %1258, %v669_v32   ;;  %v1298_v53 = vld [vmem:[#allocation2 + $0x64] ss:$12 sps:$4 sm:$0xff]   ;;  %v1312_v54 = vld [vmem:[#allocation2 + $0xc8] ss:$12 sps:$4 sm:$0xff]   ;;  %v684_v57 = vld [vmem:[%s1872_s2 + $0x98] sm:$0xff] }
  0x1f   :  { %v682_v55 = vld [vmem:[%s1872_s2 + $0x88] sm:$0xff]  ;;  %v683_v58 = vld [vmem:[%s1872_s2 + $0x90] sm:$0xff]  ;;  %v1320_v62 = vld [vmem:[#allocation2 + $0xf8] ss:$12 sps:$4 sm:$0xff]  }
  0x20   :  { %418 = vmatpush1.bf16.xpose.msra.mxu0 %v1271_v13  ;;  %1220 = vmatpush3.bf16.xpose.msra.mxu1 %v399_v15  ;;  %v1300_v59 = vld [vmem:[#allocation2 + $0x60] ss:$12 sps:$4 sm:$0xff]   ;;  %v1301_v61 = vld [vmem:[#allocation2 + $0x7c] ss:$12 sps:$4 sm:$0xff]   ;;  %v687_v2 = vld [vmem:[%s1872_s2 + $0xb0] sm:$0xff] }
  0x21   :  { %419 = vmatprep.subr.bf16.mxu0 %v1272_v14  ;;  %1252 = vmatprep.subr.msk.bf16.mxu1 %vm355_vm0, %v1274_v16  ;;  %v1313_v60 = vld [vmem:[#allocation2 + $0xe0] ss:$12 sps:$4 sm:$0xff]   ;;  %v688_v1 = vld [vmem:[%s1872_s2 + $0xb8] sm:$0xff]  ;;  %v1311_v8 = vld [vmem:[#allocation2 + $0xa8] ss:$12 sps:$4 sm:$0xff]  }
  0x22   :  { %727 = vperm.xlu1 %1259, %v672_v33   ;;  %722 = vperm.xlu0 %1258, %v671_v34   ;;  %v686_v63 = vld [vmem:[%s1872_s2 + $0xa8] sm:$0xff]  ;;  %v685_v0 = vld [vmem:[%s1872_s2 + $0xa0] sm:$0xff]  ;;  %v1321_v4 = vld [vmem:[#allocation2 + $0x110] ss:$12 sps:$4 sm:$0xff]  }
  0x23   :  { %v1303_v3 = vld [vmem:[#allocation2 + $0x78] ss:$12 sps:$4 sm:$0xff]   ;;  %v1306_v5 = vld [vmem:[#allocation2 + $0x94] ss:$12 sps:$4 sm:$0xff]   ;;  %v1308_v6 = vld [vmem:[#allocation2 + $0x90] ss:$12 sps:$4 sm:$0xff]  }
  0x24   :  { %v1309_v7 = vld [vmem:[#allocation2 + $0xac] ss:$12 sps:$4 sm:$0xff]   ;;  %v1314_v9 = vld [vmem:[#allocation2 + $0xc4] ss:$12 sps:$4 sm:$0xff]   ;;  %v1317_v11 = vld [vmem:[#allocation2 + $0xdc] ss:$12 sps:$4 sm:$0xff]  }
  0x25   :  { %v1316_v10 = vld [vmem:[#allocation2 + $0xc0] ss:$12 sps:$4 sm:$0xff]   ;;  %v1319_v12 = vld [vmem:[#allocation2 + $0xd8] ss:$12 sps:$4 sm:$0xff]   ;;  %v1324_v14 = vld [vmem:[#allocation2 + $0xf0] ss:$12 sps:$4 sm:$0xff]  }
  0x26   :  { %737 = vperm.xlu1 %1259, %v674_v39   ;;  %732 = vperm.xlu0 %1258, %v673_v40   ;;  %v1322_v13 = vld [vmem:[#allocation2 + $0xf4] ss:$12 sps:$4 sm:$0xff]   ;;  %v1325_v15 = vld [vmem:[#allocation2 + $0x10c] ss:$12 sps:$4 sm:$0xff]  }
  0x27   :  { %v1327_v16 = vld [vmem:[#allocation2 + $0x108] ss:$12 sps:$4 sm:$0xff]  }
  0x28   :  { %420 = vmatpush1.bf16.xpose.msra.mxu0 %v1275_v17  ;;  %1222 = vmatpush3.bf16.xpose.msra.mxu1 %v396_v19 }
  0x29   :  { %421 = vmatprep.subr.bf16.mxu0 %v1276_v18  ;;  %1253 = vmatprep.subr.msk.bf16.mxu1 %vm355_vm0, %v1278_v20  ;;  %v1572_v20 = vld [vmem:[%s1873_s3] ss:$0 sm:$0xff] }
  0x2a   :  { %747 = vperm.xlu1 %1259, %v676_v41   ;;  %742 = vperm.xlu0 %1258, %v675_v42  }
  0x2e   :  { %757 = vperm.xlu1 %1259, %v678_v47   ;;  %752 = vperm.xlu0 %1258, %v677_v48  }
  0x30   :  { %422 = vmatpush1.bf16.xpose.msra.mxu0 %v1279_v21  ;;  %1224 = vmatpush3.bf16.xpose.msra.mxu1 %v393_v22 }
  0x32   :  { %767 = vperm.xlu1 %1259, %v680_v49   ;;  %762 = vperm.xlu0 %1258, %v679_v50  }
  0x36   :  { %777 = vperm.xlu1 %1259, %v682_v55   ;;  %772 = vperm.xlu0 %1258, %v681_v56  }
  0x37   :  { %440 = vmatmul.mubr.bf16.vlgmr.msra.gmra.mxu0 %v1280_v27  ;;  %1226 = vmatmul.mubr.msk.bf16.vlgmr.msra.gmra.mxu1 %vm355_vm0, %v1284_v28 }
  0x38   :  { %447 = vmatprep.mubr.bf16.mxu0 %v1285_v29  ;;  %1229 = vmatprep.mubr.msk.bf16.mxu1 %vm355_vm0, %v1288_v30 }
  0x3a   :  { %787 = vperm.xlu1 %1259, %v684_v57   ;;  %782 = vperm.xlu0 %1258, %v683_v58  }
  0x3e   :  { %797 = vperm.xlu1 %1259, %v686_v63   ;;  %792 = vperm.xlu0 %1258, %v685_v0  }
  0x3f   :  { %448 = vmatmul.mubr.bf16.gmra.mxu0 %v1287_v35  ;;  %1230 = vmatmul.mubr.msk.bf16.gmra.mxu1 %vm355_vm0, %v1289_v36 }
  0x40   :  { %455 = vmatprep.mubr.bf16.mxu0 %v1290_v37  ;;  %1233 = vmatprep.mubr.msk.bf16.mxu1 %vm355_vm0, %v1296_v38 }
  0x42   :  { %807 = vperm.xlu1 %1259, %v688_v1   ;;  %802 = vperm.xlu0 %1258, %v687_v2  }
  0x47   :  { %456 = vmatmul.mubr.bf16.gmra.mxu0 %v1292_v43  ;;  %1234 = vmatmul.mubr.msk.bf16.gmra.mxu1 %vm355_vm0, %v1297_v44 }
  0x48   :  { %463 = vmatprep.mubr.bf16.mxu0 %v1293_v45  ;;  %1237 = vmatprep.mubr.msk.bf16.mxu1 %vm355_vm0, %v1304_v46 }
  0x4f   :  { %464 = vmatmul.mubr.bf16.gmra.mxu0 %v1295_v51  ;;  %1238 = vmatmul.mubr.msk.bf16.gmra.mxu1 %vm355_vm0, %v1305_v52 }
  0x50   :  { %471 = vmatprep.mubr.bf16.mxu0 %v1298_v53  ;;  %1241 = vmatprep.mubr.msk.bf16.mxu1 %vm355_vm0, %v1312_v54 }
  0x57   :  { %472 = vmatmul.mubr.bf16.gmra.mxu0 %v1300_v59  ;;  %1242 = vmatmul.mubr.msk.bf16.gmra.mxu1 %vm355_vm0, %v1313_v60 }
  0x58   :  { %479 = vmatprep.mubr.bf16.mxu0 %v1301_v61  ;;  %1245 = vmatprep.mubr.msk.bf16.mxu1 %vm355_vm0, %v1320_v62 }
  0x5f   :  { %480 = vmatmul.mubr.bf16.gmra.mxu0 %v1303_v3  ;;  %1246 = vmatmul.mubr.msk.bf16.gmra.mxu1 %vm355_vm0, %v1321_v4 }
  0x60   :  { %487 = vmatprep.mubr.bf16.mxu0 %v1306_v5 }
  0x67   :  { %488 = vmatmul.mubr.bf16.gmra.mxu0 %v1308_v6 }
  0x68   :  { %495 = vmatprep.mubr.bf16.mxu0 %v1309_v7 }
  0x6f   :  { %496 = vmatmul.mubr.bf16.gmra.mxu0 %v1311_v8 }
  0x70   :  { %503 = vmatprep.mubr.bf16.mxu0 %v1314_v9 }
  0x77   :  { %504 = vmatmul.mubr.bf16.gmra.mxu0 %v1316_v10 }
  0x78   :  { %511 = vmatprep.mubr.bf16.mxu0 %v1317_v11 }
  0x7f   :  { %512 = vmatmul.mubr.bf16.gmra.mxu0 %v1319_v12 }
  0x80   :  { %519 = vmatprep.mubr.bf16.mxu0 %v1322_v13 }
  0x87   :  { %520 = vmatmul.mubr.bf16.gmra.mxu0 %v1324_v14 }
  0x88   :  { %527 = vmatprep.mubr.bf16.mxu0 %v1325_v15 }
  0x8f   :  { %528 = vmatmul.mubr.bf16.gmra.mxu0 %v1327_v16 }
  0x90   :  { %v703_v32 = vpop.permute.xlu1 %702 }
  0x91   :  { %v693_v17 = vpop.permute.xlu0 %692  ;;  %v818_v40 = vmul.f32 %v1572_v20, %v703_v32 }
  0x92   :  { %v816_v24 = vmul.f32 %v1572_v20, %v693_v17 }
  0x95   :  { %v698_v25 = vpop.permute.xlu0 %697  ;;  %v708_v49 = vpop.permute.xlu1 %707 }
  0x96   :  { %v817_v34 = vmul.f32 %v1572_v20, %v698_v25  ;;  %v819_v52 = vmul.f32 %v1572_v20, %v708_v49 }
  0x99   :  { %v713_v58 = vpop.permute.xlu0 %712  ;;  %v718_v4 = vpop.permute.xlu1 %717 }
  0x9a   :  { %v820_v60 = vmul.f32 %v1572_v20, %v713_v58  ;;  %v821_v8 = vmul.f32 %v1572_v20, %v718_v4 }
  0x9d   :  { %v723_v14 = vpop.permute.xlu0 %722 }
  0x9e   :  { %v822_v17 = vmul.f32 %v1572_v20, %v723_v14 }
  0xf7   :  { %v441_v18 = vpop.f32.mrf.mxu0  ;;  %v1227_v19 = vpop.f32.mrf.mxu1 }
  0xf9   :  { %v443_v21 = vpop.f32.mrf.mxu0  ;;  %v570_v22 = vpop.f32.mrf.mxu1 }
  0xfa   :  { %v571_v23 = vadd.f32 %v570_v22, %v441_v18 }
  0xfb   :  { %v444_v26 = vpop.f32.mrf.mxu0  ;;  %v1228_v27 = vpop.f32.mrf.mxu1 }
  0xfc   :  { %v840_v28 = vmul.f32 2.0, %v571_v23 }
  0xfd   :  { %v446_v29 = vpop.f32.mrf.mxu0  ;;  %v573_v30 = vpop.f32.mrf.mxu1 }
  0xfe   :  { %v864_v31 = vmul.f32 %v840_v28, %v816_v24  ;;  %v574_v33 = vadd.f32 %v573_v30, %v444_v26 }
  0xff   :  { %v449_v35 = vpop.f32.mrf.mxu0  ;;  %v1231_v36 = vpop.f32.mrf.mxu1 }
 0x100   :  { %v888_v37 = vsub.f32 2.0, %v864_v31  ;;  %v841_v38 = vmul.f32 2.0, %v574_v33  ;;  %v579_v39 = vadd.f32 %v1227_v19, %v449_v35  ;;  %v728_v33 = vpop.permute.xlu1 %727 }
 0x101   :  { %v451_v41 = vpop.f32.mrf.mxu0  ;;  %v586_v45 = vpop.f32.mrf.mxu1 }
 0x102   :  { %v912_v42 = vmax.f32 %v888_v37, 0.0  ;;  %v865_v43 = vmul.f32 %v841_v38, %v817_v34  ;;  %v842_v44 = vmul.f32 2.0, %v579_v39 }
 0x103   :  { %v452_v46 = vpop.f32.mrf.mxu0  ;;  %v1232_v53 = vpop.f32.mrf.mxu1 }
 0x104   :  { %1328 = vrsqrt.f32 %v912_v42  ;;  %v889_v47 = vsub.f32 2.0, %v865_v43  ;;  %v866_v48 = vmul.f32 %v842_v44, %v818_v40  ;;  %v582_v50 = vadd.f32 %v1228_v27, %v452_v46 }
 0x105   :  { %v454_v51 = vpop.f32.mrf.mxu0  ;;  %v589_v1 = vpop.f32.mrf.mxu1  ;;  %vm938_vm2 = vcmp.eq.f32.partialorder %v912_v42, inf  ;;  %v941_v24 = vand.u32 2147483648, %v912_v42  ;;  %vm940_vm3 = vcmp.eq.f32.partialorder %v912_v42, 0.0 }
 0x106   :  { %v1578_v54 = vmax.f32 %v889_v47, 0.0  ;;  %v890_v55 = vsub.f32 2.0, %v866_v48  ;;  %v843_v56 = vmul.f32 2.0, %v582_v50 }
 0x107   :  { %v457_v57 = vpop.f32.mrf.mxu0  ;;  %v1588_v13 = vpop.f32.mrf.mxu1 }
 0x108   :  { %v587_v59 = vadd.f32 %v586_v45, %v457_v57  ;;  %1330 = vrsqrt.f32 %v1578_v54  ;;  %v1582_v62 = vmax.f32 %v890_v55, 0.0  ;;  %v867_v63 = vmul.f32 %v843_v56, %v819_v52 }
 0x109   :  { %v459_v61 = vpop.f32.mrf.mxu0  ;;  %v602_v26 = vpop.f32.mrf.mxu1  ;;  %vm945_vm4 = vcmp.eq.f32.partialorder %v1578_v54, inf  ;;  %v948_v41 = vand.u32 2147483648, %v1578_v54  ;;  %vm947_vm5 = vcmp.eq.f32.partialorder %v1578_v54, 0.0 }
 0x10a   :  { %v844_v0 = vmul.f32 2.0, %v587_v59  ;;  %1332 = vrsqrt.f32 %v1582_v62  ;;  %v891_v3 = vsub.f32 2.0, %v867_v63  ;;  %vm952_vm6 = vcmp.eq.f32.partialorder %v1582_v62, inf }
 0x10b   :  { %v460_v2 = vpop.f32.mrf.mxu0  ;;  %v1603_v40 = vpop.f32.mrf.mxu1  ;;  %v955_v52 = vand.u32 2147483648, %v1582_v62  ;;  %vm954_vm7 = vcmp.eq.f32.partialorder %v1582_v62, 0.0 }
 0x10c   :  { %v868_v5 = vmul.f32 %v844_v0, %v820_v60  ;;  %v590_v6 = vadd.f32 %v589_v1, %v460_v2  ;;  %v1586_v9 = vmax.f32 %v891_v3, 0.0  ;;  %v738_v0 = vpop.permute.xlu1 %737 }
 0x10d   :  { %v462_v7 = vpop.f32.mrf.mxu0  ;;  %v605_v56 = vpop.f32.mrf.mxu1  ;;  %v825_v3 = vmul.f32 %v1572_v20, %v738_v0 }
 0x10e   :  { %v892_v10 = vsub.f32 2.0, %v868_v5  ;;  %v845_v11 = vmul.f32 2.0, %v590_v6  ;;  %1334 = vrsqrt.f32 %v1586_v9  ;;  %vm959_vm8 = vcmp.eq.f32.partialorder %v1586_v9, inf }
 0x10f   :  { %v465_v12 = vpop.f32.mrf.mxu0  ;;  %v1631_v6 = vpop.f32.mrf.mxu1  ;;  %v962_v7 = vand.u32 2147483648, %v1586_v9  ;;  %vm961_vm9 = vcmp.eq.f32.partialorder %v1586_v9, 0.0 }
 0x110   :  { %v595_v15 = vadd.f32 %v1231_v36, %v465_v12  ;;  %v1592_v21 = vmax.f32 %v892_v10, 0.0  ;;  %v869_v22 = vmul.f32 %v845_v11, %v821_v8  ;;  %v823_v36 = vmul.f32 %v1572_v20, %v728_v33 }
 0x111   :  { %v1329_v16 = vpop.eup %1328  ;;  %v467_v18 = vpop.f32.mrf.mxu0 }
 0x112   :  { %v937_v19 = vmul.f32 %v1329_v16, %v912_v42  ;;  %v846_v23 = vmul.f32 2.0, %v595_v15  ;;  %1336 = vrsqrt.f32 %v1592_v21  ;;  %v893_v29 = vsub.f32 2.0, %v869_v22 }
 0x113   :  { %v468_v25 = vpop.f32.mrf.mxu0  ;;  %vm966_vm10 = vcmp.eq.f32.partialorder %v1592_v21, inf  ;;  %vm968_vm11 = vcmp.eq.f32.partialorder %v1592_v21, 0.0 }
 0x114   :  { %v939_v27 = vsel %vm938_vm2, %v912_v42, %v937_v19  ;;  %v870_v30 = vmul.f32 %v846_v23, %v822_v17  ;;  %v598_v34 = vadd.f32 %v1232_v53, %v468_v25  ;;  %v1601_v37 = vmax.f32 %v893_v29, 0.0  ;;  %v733_v42 = vpop.permute.xlu0 %732 }
 0x115   :  { %v942_v28 = vsel %vm940_vm3, %v941_v24, %v939_v27  ;;  %v470_v31 = vpop.f32.mrf.mxu0  ;;  %v1331_v32 = vpop.eup %1330  ;;  %v824_v47 = vmul.f32 %v1572_v20, %v733_v42 }
 0x116   :  { %1105 = vst.msk [vmem:[%s1874_s4] sm:$0xff] %vm1104_vm1, %v942_v28  ;;  %v944_v35 = vmul.f32 %v1331_v32, %v1578_v54  ;;  %v894_v38 = vsub.f32 2.0, %v870_v30  ;;  %v847_v43 = vmul.f32 2.0, %v598_v34  ;;  %1338 = vrsqrt.f32 %v1601_v37  ;;  %v618_v24 = vpop.f32.mrf.mxu1  ;;  %v748_v31 = vpop.permute.xlu1 %747 }
 0x117   :  { %v473_v39 = vpop.f32.mrf.mxu0  ;;  %v1333_v45 = vpop.eup %1332  ;;  %v827_v34 = vmul.f32 %v1572_v20, %v748_v31  ;;  %vm973_vm12 = vcmp.eq.f32.partialorder %v1601_v37, inf  ;;  %vm975_vm13 = vcmp.eq.f32.partialorder %v1601_v37, 0.0 }
 0x118   :  { %v603_v44 = vadd.f32 %v602_v26, %v473_v39  ;;  %v946_v46 = vsel %vm945_vm4, %v1578_v54, %v944_v35  ;;  %v951_v50 = vmul.f32 %v1333_v45, %v1582_v62  ;;  %v1612_v51 = vmax.f32 %v894_v38, 0.0  ;;  %v743_v8 = vpop.permute.xlu0 %742  ;;  %v1661_v38 = vpop.f32.mrf.mxu1 }
 0x119   :  { %v475_v48 = vpop.f32.mrf.mxu0  ;;  %v949_v49 = vsel %vm947_vm5, %v948_v41, %v946_v46  ;;  %v871_v53 = vmul.f32 %v847_v43, %v823_v36  ;;  %v826_v15 = vmul.f32 %v1572_v20, %v743_v8  ;;  %v976_v39 = vand.u32 2147483648, %v1601_v37 }
 0x11a   :  { %1106 = vst.msk [vmem:[%s1874_s4 + $0x8] sm:$0xff] %vm1104_vm1, %v949_v49  ;;  %v848_v54 = vmul.f32 2.0, %v603_v44  ;;  %v953_v57 = vsel %vm952_vm6, %v1582_v62, %v951_v50  ;;  %1340 = vrsqrt.f32 %v1612_v51  ;;  %vm980_vm14 = vcmp.eq.f32.partialorder %v1612_v51, inf }
 0x11b   :  { %v476_v55 = vpop.f32.mrf.mxu0  ;;  %v956_v58 = vsel %vm954_vm7, %v955_v52, %v953_v57  ;;  %v895_v59 = vsub.f32 2.0, %v871_v53  ;;  %v1335_v63 = vpop.eup %1334  ;;  %v983_v50 = vand.u32 2147483648, %v1612_v51  ;;  %vm982_vm15 = vcmp.eq.f32.partialorder %v1612_v51, 0.0 }
 0x11c   :  { %v872_v60 = vmul.f32 %v848_v54, %v824_v47  ;;  %1107 = vst.msk [vmem:[%s1874_s4 + $0x10] sm:$0xff] %vm1104_vm1, %v956_v58  ;;  %v606_v1 = vadd.f32 %v605_v56, %v476_v55  ;;  %v958_v2 = vmul.f32 %v1335_v63, %v1586_v9  ;;  %v753_v41 = vpop.permute.xlu0 %752  ;;  %v621_v54 = vpop.f32.mrf.mxu1 }
 0x11d   :  { %v478_v61 = vpop.f32.mrf.mxu0  ;;  %v1629_v4 = vmax.f32 %v895_v59, 0.0  ;;  %v828_v45 = vmul.f32 %v1572_v20, %v753_v41 }
 0x11e   :  { %v896_v62 = vsub.f32 2.0, %v872_v60  ;;  %v849_v10 = vmul.f32 2.0, %v606_v1  ;;  %v960_v14 = vsel %vm959_vm8, %v1586_v9, %v958_v2 }
 0x11f   :  { %v481_v5 = vpop.f32.mrf.mxu0  ;;  %v1337_v12 = vpop.eup %1336  ;;  %1342 = vrsqrt.f32 %v1629_v4  ;;  %v963_v17 = vsel %vm961_vm9, %v962_v7, %v960_v14  ;;  %vm987_vm0 = vcmp.eq.f32.partialorder %v1629_v4, inf  ;;  %vm989_vm2 = vcmp.eq.f32.partialorder %v1629_v4, 0.0 }
 0x120   :  { %v611_v11 = vadd.f32 %v1588_v13, %v481_v5  ;;  %v965_v18 = vmul.f32 %v1337_v12, %v1592_v21  ;;  %v1641_v19 = vmax.f32 %v896_v62, 0.0  ;;  %1108 = vst.msk [vmem:[%s1874_s4 + $0x18] sm:$0xff] %vm1104_vm1, %v963_v17  ;;  %v969_v13 = vand.u32 2147483648, %v1592_v21  ;;  %v758_v62 = vpop.permute.xlu1 %757  ;;  %v763_v12 = vpop.permute.xlu0 %762 }
 0x121   :  { %v483_v16 = vpop.f32.mrf.mxu0  ;;  %v873_v9 = vmul.f32 %v849_v10, %v825_v3  ;;  %v990_v3 = vand.u32 2147483648, %v1629_v4  ;;  %v830_v17 = vmul.f32 %v1572_v20, %v763_v12 }
 0x122   :  { %v850_v22 = vmul.f32 2.0, %v611_v11  ;;  %v967_v25 = vsel %vm966_vm10, %v1592_v21, %v965_v18  ;;  %1344 = vrsqrt.f32 %v1641_v19  ;;  %v829_v11 = vmul.f32 %v1572_v20, %v758_v62 }
 0x123   :  { %v484_v23 = vpop.f32.mrf.mxu0  ;;  %v970_v26 = vsel %vm968_vm11, %v969_v13, %v967_v25  ;;  %v897_v27 = vsub.f32 2.0, %v873_v9  ;;  %v1339_v30 = vpop.eup %1338  ;;  %vm994_vm3 = vcmp.eq.f32.partialorder %v1641_v19, inf  ;;  %vm996_vm4 = vcmp.eq.f32.partialorder %v1641_v19, 0.0 }
 0x124   :  { %v874_v28 = vmul.f32 %v850_v22, %v826_v15  ;;  %1109 = vst.msk [vmem:[%s1874_s4 + $0x20] sm:$0xff] %vm1104_vm1, %v970_v26  ;;  %v614_v32 = vadd.f32 %v1603_v40, %v484_v23  ;;  %v972_v33 = vmul.f32 %v1339_v30, %v1601_v37 }
 0x125   :  { %v486_v29 = vpop.f32.mrf.mxu0  ;;  %v1659_v21 = vmax.f32 %v897_v27, 0.0 }
 0x126   :  { %v898_v35 = vsub.f32 2.0, %v874_v28  ;;  %v851_v42 = vmul.f32 2.0, %v614_v32  ;;  %v974_v40 = vsel %vm973_vm12, %v1601_v37, %v972_v33 }
 0x127   :  { %v489_v36 = vpop.f32.mrf.mxu0  ;;  %v1341_v44 = vpop.eup %1340  ;;  %1346 = vrsqrt.f32 %v1659_v21  ;;  %v977_v47 = vsel %vm975_vm13, %v976_v39, %v974_v40  ;;  %vm1001_vm5 = vcmp.eq.f32.partialorder %v1659_v21, inf  ;;  %vm1003_vm6 = vcmp.eq.f32.partialorder %v1659_v21, 0.0 }
 0x128   :  { %v619_v43 = vadd.f32 %v618_v24, %v489_v36  ;;  %v979_v48 = vmul.f32 %v1341_v44, %v1612_v51  ;;  %v1670_v49 = vmax.f32 %v898_v35, 0.0  ;;  %1110 = vst.msk [vmem:[%s1874_s4 + $0x28] sm:$0xff] %vm1104_vm1, %v977_v47  ;;  %v875_v37 = vmul.f32 %v851_v42, %v827_v34  ;;  %v768_v34 = vpop.permute.xlu1 %767 }
 0x129   :  { %v491_v46 = vpop.f32.mrf.mxu0  ;;  %v1004_v35 = vand.u32 2147483648, %v1659_v21  ;;  %v831_v42 = vmul.f32 %v1572_v20, %v768_v34 }
 0x12a   :  { %v852_v52 = vmul.f32 2.0, %v619_v43  ;;  %v981_v55 = vsel %vm980_vm14, %v1612_v51, %v979_v48  ;;  %1348 = vrsqrt.f32 %v1670_v49  ;;  %v899_v57 = vsub.f32 2.0, %v875_v37  ;;  %v1688_v51 = vpop.f32.mrf.mxu1  ;;  %v773_v43 = vpop.permute.xlu0 %772 }
 0x12b   :  { %v492_v53 = vpop.f32.mrf.mxu0  ;;  %v984_v56 = vsel %vm982_vm15, %v983_v50, %v981_v55  ;;  %vm1008_vm7 = vcmp.eq.f32.partialorder %v1670_v49, inf  ;;  %vm1010_vm8 = vcmp.eq.f32.partialorder %v1670_v49, 0.0 }
 0x12c   :  { %v876_v58 = vmul.f32 %v852_v52, %v828_v45  ;;  %v1343_v60 = vpop.eup %1342  ;;  %1111 = vst.msk [vmem:[%s1874_s4 + $0x30] sm:$0xff] %vm1104_vm1, %v984_v56  ;;  %v622_v61 = vadd.f32 %v621_v54, %v492_v53  ;;  %v1686_v0 = vmax.f32 %v899_v57, 0.0  ;;  %v634_v22 = vpop.f32.mrf.mxu1  ;;  %v832_v45 = vmul.f32 %v1572_v20, %v773_v43 }
 0x12d   :  { %v494_v59 = vpop.f32.mrf.mxu0  ;;  %v986_v63 = vmul.f32 %v1343_v60, %v1629_v4 }
 0x12e   :  { %v900_v1 = vsub.f32 2.0, %v876_v58  ;;  %v853_v5 = vmul.f32 2.0, %v622_v61  ;;  %1350 = vrsqrt.f32 %v1686_v0  ;;  %v1718_v33 = vpop.f32.mrf.mxu1  ;;  %vm1015_vm9 = vcmp.eq.f32.partialorder %v1686_v0, inf }
 0x12f   :  { %v497_v2 = vpop.f32.mrf.mxu0  ;;  %v1345_v8 = vpop.eup %1344  ;;  %v988_v10 = vsel %vm987_vm0, %v1629_v4, %v986_v63  ;;  %v997_v4 = vand.u32 2147483648, %v1641_v19  ;;  %vm1017_vm10 = vcmp.eq.f32.partialorder %v1686_v0, 0.0 }
 0x130   :  { %v627_v7 = vadd.f32 %v1631_v6, %v497_v2  ;;  %v991_v15 = vsel %vm989_vm2, %v990_v3, %v988_v10  ;;  %v993_v16 = vmul.f32 %v1345_v8, %v1641_v19  ;;  %v1699_v18 = vmax.f32 %v900_v1, 0.0  ;;  %v637_v52 = vpop.f32.mrf.mxu1  ;;  %v778_v2 = vpop.permute.xlu1 %777 }
 0x131   :  { %v499_v14 = vpop.f32.mrf.mxu0  ;;  %1112 = vst.msk [vmem:[%s1874_s4 + $0x38] sm:$0xff] %vm1104_vm1, %v991_v15  ;;  %v877_v6 = vmul.f32 %v853_v5, %v829_v11  ;;  %v1018_v3 = vand.u32 2147483648, %v1686_v0  ;;  %v833_v8 = vmul.f32 %v1572_v20, %v778_v2  ;;  %v783_v10 = vpop.permute.xlu0 %782 }
 0x132   :  { %v854_v13 = vmul.f32 2.0, %v627_v7  ;;  %v995_v23 = vsel %vm994_vm3, %v1641_v19, %v993_v16  ;;  %1352 = vrsqrt.f32 %v1699_v18  ;;  %v834_v14 = vmul.f32 %v1572_v20, %v783_v10 }
 0x133   :  { %v500_v9 = vpop.f32.mrf.mxu0  ;;  %v998_v24 = vsel %vm996_vm4, %v997_v4, %v995_v23  ;;  %v901_v25 = vsub.f32 2.0, %v877_v6  ;;  %vm1022_vm11 = vcmp.eq.f32.partialorder %v1699_v18, inf  ;;  %vm1024_vm12 = vcmp.eq.f32.partialorder %v1699_v18, 0.0 }
 0x134   :  { %v878_v26 = vmul.f32 %v854_v13, %v830_v17  ;;  %v1347_v28 = vpop.eup %1346  ;;  %1113 = vst.msk [vmem:[%s1874_s4 + $0x40] sm:$0xff] %vm1104_vm1, %v998_v24  ;;  %v630_v29 = vadd.f32 %v1661_v38, %v500_v9 }
 0x135   :  { %v502_v27 = vpop.f32.mrf.mxu0  ;;  %v1000_v30 = vmul.f32 %v1347_v28, %v1659_v21  ;;  %v1716_v31 = vmax.f32 %v901_v25, 0.0 }
 0x136   :  { %v902_v32 = vsub.f32 2.0, %v878_v26  ;;  %v855_v36 = vmul.f32 2.0, %v630_v29 }
 0x137   :  { %v505_v19 = vpop.f32.mrf.mxu0  ;;  %v1349_v41 = vpop.eup %1348  ;;  %v1002_v38 = vsel %vm1001_vm5, %v1659_v21, %v1000_v30  ;;  %1354 = vrsqrt.f32 %v1716_v31  ;;  %v1011_v21 = vand.u32 2147483648, %v1670_v49  ;;  %vm1029_vm13 = vcmp.eq.f32.partialorder %v1716_v31, inf }
 0x138   :  { %v635_v39 = vadd.f32 %v634_v22, %v505_v19  ;;  %v1005_v40 = vsel %vm1003_vm6, %v1004_v35, %v1002_v38  ;;  %v1007_v46 = vmul.f32 %v1349_v41, %v1670_v49  ;;  %v1728_v47 = vmax.f32 %v902_v32, 0.0  ;;  %v788_v19 = vpop.permute.xlu1 %787 }
 0x139   :  { %v507_v44 = vpop.f32.mrf.mxu0  ;;  %1114 = vst.msk [vmem:[%s1874_s4 + $0x48] sm:$0xff] %vm1104_vm1, %v1005_v40  ;;  %v879_v48 = vmul.f32 %v855_v36, %v831_v42  ;;  %v1032_v34 = vand.u32 2147483648, %v1716_v31  ;;  %v835_v41 = vmul.f32 %v1572_v20, %v788_v19  ;;  %v793_v42 = vpop.permute.xlu0 %792  ;;  %vm1031_vm14 = vcmp.eq.f32.partialorder %v1716_v31, 0.0 }
 0x13a   :  { %v856_v50 = vmul.f32 2.0, %v635_v39  ;;  %v1009_v53 = vsel %vm1008_vm7, %v1670_v49, %v1007_v46  ;;  %1356 = vrsqrt.f32 %v1728_v47  ;;  %v1746_v49 = vpop.f32.mrf.mxu1  ;;  %v836_v43 = vmul.f32 %v1572_v20, %v793_v42 }
 0x13b   :  { %v508_v37 = vpop.f32.mrf.mxu0  ;;  %v1012_v54 = vsel %vm1010_vm8, %v1011_v21, %v1009_v53  ;;  %v903_v55 = vsub.f32 2.0, %v879_v48  ;;  %v1351_v58 = vpop.eup %1350  ;;  %vm1036_vm15 = vcmp.eq.f32.partialorder %v1728_v47, inf  ;;  %v1039_v46 = vand.u32 2147483648, %v1728_v47 }
 0x13c   :  { %v880_v56 = vmul.f32 %v856_v50, %v832_v45  ;;  %1115 = vst.msk [vmem:[%s1874_s4 + $0x50] sm:$0xff] %vm1104_vm1, %v1012_v54  ;;  %v638_v59 = vadd.f32 %v637_v52, %v508_v37  ;;  %v1014_v60 = vmul.f32 %v1351_v58, %v1686_v0  ;;  %v650_v13 = vpop.f32.mrf.mxu1  ;;  %vm1038_vm0 = vcmp.eq.f32.partialorder %v1728_v47, 0.0 }
 0x13d   :  { %v510_v57 = vpop.f32.mrf.mxu0  ;;  %v1744_v61 = vmax.f32 %v903_v55, 0.0  ;;  %v803_v58 = vpop.permute.xlu0 %802 }
 0x13e   :  { %v904_v63 = vsub.f32 2.0, %v880_v56  ;;  %v857_v62 = vmul.f32 2.0, %v638_v59  ;;  %v1016_v11 = vsel %vm1015_vm9, %v1686_v0, %v1014_v60  ;;  %v1776_v32 = vpop.f32.mrf.mxu1 }
 0x13f   :  { %v513_v1 = vpop.f32.mrf.mxu0  ;;  %v1353_v7 = vpop.eup %1352  ;;  %1358 = vrsqrt.f32 %v1744_v61  ;;  %v1019_v15 = vsel %vm1017_vm10, %v1018_v3, %v1016_v11  ;;  %vm1043_vm2 = vcmp.eq.f32.partialorder %v1744_v61, inf  ;;  %v1046_v2 = vand.u32 2147483648, %v1744_v61 }
 0x140   :  { %v643_v5 = vadd.f32 %v1688_v51, %v513_v1  ;;  %v1021_v16 = vmul.f32 %v1353_v7, %v1699_v18  ;;  %v1757_v17 = vmax.f32 %v904_v63, 0.0  ;;  %1116 = vst.msk [vmem:[%s1874_s4 + $0x58] sm:$0xff] %vm1104_vm1, %v1019_v15  ;;  %v1025_v51 = vand.u32 2147483648, %v1699_v18  ;;  %v653_v50 = vpop.f32.mrf.mxu1  ;;  %v798_v1 = vpop.permute.xlu1 %797 }
 0x141   :  { %v515_v12 = vpop.f32.mrf.mxu0  ;;  %v881_v0 = vmul.f32 %v857_v62, %v833_v8  ;;  %v837_v7 = vmul.f32 %v1572_v20, %v798_v1  ;;  %vm1045_vm3 = vcmp.eq.f32.partialorder %v1744_v61, 0.0  ;;  %v838_v11 = vmul.f32 %v1572_v20, %v803_v58 }
 0x142   :  { %v858_v4 = vmul.f32 2.0, %v643_v5  ;;  %v1023_v9 = vsel %vm1022_vm11, %v1699_v18, %v1021_v16  ;;  %1360 = vrsqrt.f32 %v1757_v17  ;;  %vm1050_vm4 = vcmp.eq.f32.partialorder %v1757_v17, inf }
 0x143   :  { %v516_v6 = vpop.f32.mrf.mxu0  ;;  %v1026_v22 = vsel %vm1024_vm12, %v1025_v51, %v1023_v9  ;;  %v905_v23 = vsub.f32 2.0, %v881_v0  ;;  %vm1052_vm5 = vcmp.eq.f32.partialorder %v1757_v17, 0.0 }
 0x144   :  { %v882_v24 = vmul.f32 %v858_v4, %v834_v14  ;;  %v1355_v26 = vpop.eup %1354  ;;  %1117 = vst.msk [vmem:[%s1874_s4 + $0x60] sm:$0xff] %vm1104_vm1, %v1026_v22  ;;  %v646_v27 = vadd.f32 %v1718_v33, %v516_v6 }
 0x145   :  { %v518_v25 = vpop.f32.mrf.mxu0  ;;  %v1028_v28 = vmul.f32 %v1355_v26, %v1716_v31  ;;  %v1774_v29 = vmax.f32 %v905_v23, 0.0  ;;  %v808_v23 = vpop.permute.xlu1 %807 }
 0x146   :  { %v906_v30 = vsub.f32 2.0, %v882_v24  ;;  %v859_v35 = vmul.f32 2.0, %v646_v27 }
 0x147   :  { %v521_v18 = vpop.f32.mrf.mxu0  ;;  %v1357_v39 = vpop.eup %1356  ;;  %v1030_v33 = vsel %vm1029_vm13, %v1716_v31, %v1028_v28  ;;  %1362 = vrsqrt.f32 %v1774_v29  ;;  %vm1057_vm6 = vcmp.eq.f32.partialorder %v1774_v29, inf  ;;  %vm1059_vm7 = vcmp.eq.f32.partialorder %v1774_v29, 0.0 }
 0x148   :  { %v651_v36 = vadd.f32 %v650_v13, %v521_v18  ;;  %v1033_v44 = vsel %vm1031_vm14, %v1032_v34, %v1030_v33  ;;  %v1035_v40 = vmul.f32 %v1357_v39, %v1728_v47  ;;  %v1786_v45 = vmax.f32 %v906_v30, 0.0 }
 0x149   :  { %v523_v38 = vpop.f32.mrf.mxu0  ;;  %1118 = vst.msk [vmem:[%s1874_s4 + $0x68] sm:$0xff] %vm1104_vm1, %v1033_v44  ;;  %v883_v31 = vmul.f32 %v859_v35, %v835_v41  ;;  %v839_v18 = vmul.f32 %v1572_v20, %v808_v23 }
 0x14a   :  { %v860_v21 = vmul.f32 2.0, %v651_v36  ;;  %v1037_v37 = vsel %vm1036_vm15, %v1728_v47, %v1035_v40  ;;  %1364 = vrsqrt.f32 %v1786_v45  ;;  %vm1064_vm8 = vcmp.eq.f32.partialorder %v1786_v45, inf }
 0x14b   :  { %v524_v48 = vpop.f32.mrf.mxu0  ;;  %v1040_v52 = vsel %vm1038_vm0, %v1039_v46, %v1037_v37  ;;  %v907_v53 = vsub.f32 2.0, %v883_v31  ;;  %v1067_v36 = vand.u32 2147483648, %v1786_v45  ;;  %vm1066_vm9 = vcmp.eq.f32.partialorder %v1786_v45, 0.0 }
 0x14c   :  { %v884_v54 = vmul.f32 %v860_v21, %v836_v43  ;;  %v1359_v56 = vpop.eup %1358  ;;  %1119 = vst.msk [vmem:[%s1874_s4 + $0x70] sm:$0xff] %vm1104_vm1, %v1040_v52  ;;  %v654_v57 = vadd.f32 %v653_v50, %v524_v48 }
 0x14d   :  { %v526_v55 = vpop.f32.mrf.mxu0  ;;  %v1042_v59 = vmul.f32 %v1359_v56, %v1744_v61  ;;  %v1802_v60 = vmax.f32 %v907_v53, 0.0 }
 0x14e   :  { %v908_v63 = vsub.f32 2.0, %v884_v54  ;;  %v861_v3 = vmul.f32 2.0, %v654_v57 }
 0x14f   :  { %v529_v47 = vpop.f32.mrf.mxu0  ;;  %v1361_v5 = vpop.eup %1360  ;;  %v1044_v8 = vsel %vm1043_vm2, %v1744_v61, %v1042_v59  ;;  %1366 = vrsqrt.f32 %v1802_v60  ;;  %vm1071_vm10 = vcmp.eq.f32.partialorder %v1802_v60, inf  ;;  %v1074_v43 = vand.u32 2147483648, %v1802_v60 }
 0x150   :  { %v659_v62 = vadd.f32 %v1746_v49, %v529_v47  ;;  %v1047_v12 = vsel %vm1045_vm3, %v1046_v2, %v1044_v8  ;;  %v1049_v14 = vmul.f32 %v1361_v5, %v1757_v17  ;;  %v932_v15 = vmax.f32 %v908_v63, 0.0 }
 0x151   :  { %v531_v10 = vpop.f32.mrf.mxu0  ;;  %1120 = vst.msk [vmem:[%s1874_s4 + $0x78] sm:$0xff] %vm1104_vm1, %v1047_v12  ;;  %v1053_v49 = vand.u32 2147483648, %v1757_v17  ;;  %v885_v16 = vmul.f32 %v861_v3, %v837_v7  ;;  %vm1073_vm11 = vcmp.eq.f32.partialorder %v1802_v60, 0.0 }
 0x152   :  { %v862_v61 = vmul.f32 2.0, %v659_v62  ;;  %v1051_v0 = vsel %vm1050_vm4, %v1757_v17, %v1049_v14  ;;  %1368 = vrsqrt.f32 %v932_v15  ;;  %v1060_v17 = vand.u32 2147483648, %v1774_v29 }
 0x153   :  { %v532_v51 = vpop.f32.mrf.mxu0  ;;  %v1054_v4 = vsel %vm1052_vm5, %v1053_v49, %v1051_v0  ;;  %v909_v6 = vsub.f32 2.0, %v885_v16  ;;  %vm1078_vm12 = vcmp.eq.f32.partialorder %v932_v15, inf  ;;  %v1081_v31 = vand.u32 2147483648, %v932_v15 }
 0x154   :  { %v886_v13 = vmul.f32 %v862_v61, %v838_v11  ;;  %v1363_v22 = vpop.eup %1362  ;;  %1121 = vst.msk [vmem:[%s1874_s4 + $0x80] sm:$0xff] %vm1104_vm1, %v1054_v4  ;;  %v662_v24 = vadd.f32 %v1776_v32, %v532_v51  ;;  %vm1080_vm13 = vcmp.eq.f32.partialorder %v932_v15, 0.0 }
 0x155   :  { %v534_v9 = vpop.f32.mrf.mxu0  ;;  %v1056_v25 = vmul.f32 %v1363_v22, %v1774_v29  ;;  %v933_v26 = vmax.f32 %v909_v6, 0.0 }
 0x156   :  { %v910_v27 = vsub.f32 2.0, %v886_v13  ;;  %v863_v28 = vmul.f32 2.0, %v662_v24 }
 0x157   :  { %v1365_v30 = vpop.eup %1364  ;;  %v1058_v19 = vsel %vm1057_vm6, %v1774_v29, %v1056_v25  ;;  %1370 = vrsqrt.f32 %v933_v26  ;;  %vm1085_vm14 = vcmp.eq.f32.partialorder %v933_v26, inf  ;;  %v1088_v52 = vand.u32 2147483648, %v933_v26 }
 0x158   :  { %v1061_v34 = vsel %vm1059_vm7, %v1060_v17, %v1058_v19  ;;  %v1063_v32 = vmul.f32 %v1365_v30, %v1786_v45  ;;  %v934_v35 = vmax.f32 %v910_v27, 0.0  ;;  %v887_v39 = vmul.f32 %v863_v28, %v839_v18 }
 0x159   :  { %1122 = vst.msk [vmem:[%s1874_s4 + $0x88] sm:$0xff] %vm1104_vm1, %v1061_v34  ;;  %vm1087_vm15 = vcmp.eq.f32.partialorder %v933_v26, 0.0 }
 0x15a   :  { %v1065_v20 = vsel %vm1064_vm8, %v1786_v45, %v1063_v32  ;;  %1372 = vrsqrt.f32 %v934_v35  ;;  %v911_v41 = vsub.f32 2.0, %v887_v39  ;;  %vm1092_vm0 = vcmp.eq.f32.partialorder %v934_v35, inf }
 0x15b   :  { %v1068_v29 = vsel %vm1066_vm9, %v1067_v36, %v1065_v20  ;;  %v1095_v57 = vand.u32 2147483648, %v934_v35  ;;  %vm1094_vm2 = vcmp.eq.f32.partialorder %v934_v35, 0.0 }
 0x15c   :  { %v1367_v42 = vpop.eup %1366  ;;  %1123 = vst.msk [vmem:[%s1874_s4 + $0x90] sm:$0xff] %vm1104_vm1, %v1068_v29  ;;  %v935_v38 = vmax.f32 %v911_v41, 0.0 }
 0x15d   :  { %v1070_v33 = vmul.f32 %v1367_v42, %v1802_v60 }
 0x15e   :  { %1374 = vrsqrt.f32 %v935_v38  ;;  %vm1099_vm3 = vcmp.eq.f32.partialorder %v935_v38, inf  ;;  %v1102_v47 = vand.u32 2147483648, %v935_v38  ;;  %vm1101_vm4 = vcmp.eq.f32.partialorder %v935_v38, 0.0 }
 0x15f   :  { %v1369_v44 = vpop.eup %1368  ;;  %v1072_v40 = vsel %vm1071_vm10, %v1802_v60, %v1070_v33 }
 0x160   :  { %v1075_v45 = vsel %vm1073_vm11, %v1074_v43, %v1072_v40  ;;  %v1077_v46 = vmul.f32 %v1369_v44, %v932_v15 }
 0x161   :  { %1124 = vst.msk [vmem:[%s1874_s4 + $0x98] sm:$0xff] %vm1104_vm1, %v1075_v45 }
 0x162   :  { %v1079_v21 = vsel %vm1078_vm12, %v932_v15, %v1077_v46 }
 0x163   :  { %v1082_v48 = vsel %vm1080_vm13, %v1081_v31, %v1079_v21 }
 0x164   :  { %v1371_v50 = vpop.eup %1370  ;;  %1125 = vst.msk [vmem:[%s1874_s4 + $0xa0] sm:$0xff] %vm1104_vm1, %v1082_v48 }
 0x165   :  { %v1084_v37 = vmul.f32 %v1371_v50, %v933_v26 }
 0x167   :  { %v1373_v53 = vpop.eup %1372  ;;  %v1086_v54 = vsel %vm1085_vm14, %v933_v26, %v1084_v37 }
 0x168   :  { %v1089_v55 = vsel %vm1087_vm15, %v1088_v52, %v1086_v54  ;;  %v1091_v56 = vmul.f32 %v1373_v53, %v934_v35 }
 0x169   :  { %1126 = vst.msk [vmem:[%s1874_s4 + $0xa8] sm:$0xff] %vm1104_vm1, %v1089_v55 }
 0x16a   :  { %v1093_v58 = vsel %vm1092_vm0, %v934_v35, %v1091_v56 }
 0x16b   :  { %v1096_v59 = vsel %vm1094_vm2, %v1095_v57, %v1093_v58  ;;  %v1375_v60 = vpop.eup %1374 }
 0x16c   :  { %1127 = vst.msk [vmem:[%s1874_s4 + $0xb0] sm:$0xff] %vm1104_vm1, %v1096_v59  ;;  %v1098_v63 = vmul.f32 %v1375_v60, %v935_v38 }
 0x16e   :  { %v1100_v1 = vsel %vm1099_vm3, %v935_v38, %v1098_v63 }
 0x16f   :  { %v1103_v2 = vsel %vm1101_vm4, %v1102_v47, %v1100_v1 }
 0x170   :  { %1128 = vst.msk [vmem:[%s1874_s4 + $0xb8] sm:$0xff] %vm1104_vm1, %v1103_v2 }
 0x171   :  { %1133 = vsyncpa [#allocation3], 1 }

</bundles_post_ra>
